<compile_context>
chip_gen: v7x
topology: tpu7x:2x2x1
jax: 0.10.0
libtpu: 0.0.40
codegen_flags: <defaults>
</compile_context>

<pallas_src>
import functools

import jax
import jax.numpy as jnp
from jax.experimental import pallas as pl
from jax.experimental.pallas import tpu as pltpu

NEG_SLOPE = 0.01  # torch.nn.functional.leaky_relu default


def _leaky_relu(x, negative_slope=NEG_SLOPE):
    # max(x, a*x) == leaky_relu(x) for 0 < a < 1 (mul+max, no compare/select).
    return jnp.maximum(x, negative_slope * x)


def _round_up(n, m):
    return ((n + m - 1) // m) * m


def _pad2(a, rows, cols):
    return jnp.pad(a, ((0, rows - a.shape[0]), (0, cols - a.shape[1])))


# --------------------------------------------------------------------------
# Kernel
# --------------------------------------------------------------------------
def mlp_kernel(x_ref, w1_ref, b1_ref, w2_ref, b2_ref, w3_ref, b3_ref, o_ref):
    # x / weights arrive as bf16; MXU dots accumulate in f32; bias-add +
    # leaky_relu run in f32 on the VPU; inter-layer activations live as bf16.
    x = x_ref[...]

    h1 = jnp.dot(x, w1_ref[...], preferred_element_type=jnp.float32) + b1_ref[...]
    h1 = _leaky_relu(h1).astype(jnp.bfloat16)

    h2 = jnp.dot(h1, w2_ref[...], preferred_element_type=jnp.float32) + b2_ref[...]
    h2 = _leaky_relu(h2).astype(jnp.bfloat16)

    h3 = jnp.dot(h2, w3_ref[...], preferred_element_type=jnp.float32) + b3_ref[...]
    o_ref[...] = h3.astype(o_ref.dtype)


# --------------------------------------------------------------------------
# Device-aware sizing helpers
# --------------------------------------------------------------------------
def _vmem_budget_bytes():
    """~80% of per-core VMEM (128 MiB on v5e/v6e, 64 MiB on v7x)."""
    cap = 64 << 20  # conservative default (v7x per-TC)
    try:
        info = pltpu.get_tpu_info()
        cap = int(getattr(info, "vmem_capacity_bytes", cap))
    except Exception:
        pass
    return max(int(cap * 4 // 5), 16 << 20)


def _select_tile_b(B, per_row_bytes, avail_bytes, user_cap):
    """Largest batch tile (multiple of 16 for bf16 sublane packing) that fits."""
    tb_max = (int(avail_bytes) // max(int(per_row_bytes), 1)) // 16 * 16
    if tb_max < 16:
        return None
    cap = 1024 if user_cap is None else user_cap
    tb = min(tb_max, _round_up(B, 16), max(_round_up(cap, 16), 16))
    # Guarantee >= 2 grid steps for batches big enough to split, so the
    # ("parallel",) grid axis can feed both of v7x's TensorCores.
    if B >= 64 and _round_up(B, 16) <= tb:
        tb = _round_up((B + 1) // 2, 16)
    return max(tb, 16)


# --------------------------------------------------------------------------
# Parameter preparation (one-time pad + cast)
# --------------------------------------------------------------------------
def prepare_params(params):
    """Pad feature dims to multiples of 128 and cast weights to bf16 ONCE.

    Zero padding is exact: padded input columns hit zero weight rows, padded
    output columns have zero weights/bias, and leaky_relu(0) == 0, so zeros
    propagate through every layer.
    Returns (padded_params_dict, (in_num, h1, h2, out_num)).
    """
    w1, b1 = params["w1"], params["b1"]
    w2, b2 = params["w2"], params["b2"]
    w3, b3 = params["w3"], params["b3"]
    in_num, h1_n = w1.shape
    h2_n, out_num = w2.shape[1], w3.shape[1]

    in_p = _round_up(in_num, 128)
    h1_p = _round_up(h1_n, 128)
    h2_p = _round_up(h2_n, 128)
    out_p = _round_up(out_num, 128)

    padded = {
        "w1": _pad2(w1, in_p, h1_p).astype(jnp.bfloat16),
        "b1": _pad2(b1, 1, h1_p).astype(jnp.float32),
        "w2": _pad2(w2, h1_p, h2_p).astype(jnp.bfloat16),
        "b2": _pad2(b2, 1, h2_p).astype(jnp.float32),
        "w3": _pad2(w3, h2_p, out_p).astype(jnp.bfloat16),
        "b3": _pad2(b3, 1, out_p).astype(jnp.float32),
    }
    return padded, (in_num, h1_n, h2_n, out_num)


# --------------------------------------------------------------------------
# Forward paths
# --------------------------------------------------------------------------
@functools.partial(
    jax.jit,
    static_argnames=("tb", "out_num", "out_dtype", "single_buffer_weights",
                     "vmem_limit"))
def _mlp_forward_impl(x, w1, b1, w2, b2, w3, b3, *, tb, out_num, out_dtype,
                      single_buffer_weights, vmem_limit):
    B, _ = x.shape
    in_p, h1_p = w1.shape
    h2_p = w2.shape[1]
    out_p = w3.shape[1]

    B_p = _round_up(B, tb)
    x_p = _pad2(x, B_p, in_p).astype(jnp.bfloat16)
    grid = (B_p // tb,)

    const = lambda i: (0, 0)  # weights/biases: one block, fetched once, resident
    if single_buffer_weights:
        # Constant-index blocks never change -> single buffer (no VMEM waste).
        wspec = lambda shape: pl.BlockSpec(shape, const,
                                           pipeline_mode=pl.Buffered(1))
    else:
        wspec = lambda shape: pl.BlockSpec(shape, const)

    in_specs = [
        pl.BlockSpec((tb, in_p), lambda i: (i, 0)),  # x tile (pipelined)
        wspec((in_p, h1_p)),                          # w1 (resident)
        wspec((1, h1_p)),                             # b1
        wspec((h1_p, h2_p)),                          # w2
        wspec((1, h2_p)),                             # b2
        wspec((h2_p, out_p)),                         # w3
        wspec((1, out_p)),                            # b3
    ]
    out_spec = pl.BlockSpec((tb, out_p), lambda i: (i, 0))

    out = pl.pallas_call(
        mlp_kernel,
        out_shape=jax.ShapeDtypeStruct((B_p, out_p), out_dtype),
        grid=grid,
        in_specs=in_specs,
        out_specs=out_spec,
        compiler_params=pltpu.CompilerParams(
            dimension_semantics=("parallel",),
            vmem_limit_bytes=int(vmem_limit),
        ),
    )(x_p, w1, b1, w2, b2, w3, b3)

    return out[:B, :out_num]


@functools.partial(jax.jit, static_argnames=("out_num", "out_dtype"))
def _xla_mlp_impl(x, w1, b1, w2, b2, w3, b3, *, out_num, out_dtype):
    """Plain fused XLA path (tiny sizes / weights that exceed VMEM)."""
    x = _pad2(x, x.shape[0], w1.shape[0]).astype(jnp.bfloat16)
    h = _leaky_relu(jnp.dot(x, w1, preferred_element_type=jnp.float32) + b1)
    h = _leaky_relu(jnp.dot(h.astype(jnp.bfloat16), w2,
                            preferred_element_type=jnp.float32) + b2)
    o = jnp.dot(h.astype(jnp.bfloat16), w3,
                preferred_element_type=jnp.float32) + b3
    return o[:, :out_num].astype(out_dtype)


def mlp_forward_pallas(x, prepared, *, tile_b=None, out_dtype=jnp.float32):
    """Fused Pallas MLP forward. x: (B, in_num) f32. prepared: prepare_params()."""
    pp, dims = prepared
    out_num = dims[3]
    w1, b1, w2, b2, w3, b3 = (pp[k] for k in ("w1", "b1", "w2", "b2", "w3", "b3"))
    in_p, h1_p = w1.shape
    h2_p = w2.shape[1]
    out_p = w3.shape[1]
    B = x.shape[0]
    out_bytes = jnp.dtype(out_dtype).itemsize

    budget = _vmem_budget_bytes()
    # Single-buffered bf16 weights + f32 biases + headroom for Mosaic internals.
    w_bytes = 2 * (in_p * h1_p + h1_p * h2_p + h2_p * out_p)
    fixed = w_bytes + 4 * (h1_p + h2_p + out_p) + (2 << 20)
    # Per batch-row: double-buffered bf16 x tile, double-buffered out tile,
    # f32 dot result + bf16 activation temporaries per hidden layer, f32 h3.
    per_row = (2 * in_p * 2 + 2 * out_p * out_bytes
               + 6 * (h1_p + h2_p) + 4 * out_p)

    tb = _select_tile_b(B, per_row, budget - fixed, tile_b)
    if tb is None:
        # TODO(synk): add a hidden-dim (K/N) tiled Pallas path for weight
        # matrices that exceed the per-core VMEM budget; fall back to XLA.
        return _xla_mlp_impl(x, w1, b1, w2, b2, w3, b3,
                             out_num=out_num, out_dtype=out_dtype)

    vmem_limit = budget
    try:
        return _mlp_forward_impl(
            x, w1, b1, w2, b2, w3, b3, tb=tb, out_num=out_num,
            out_dtype=out_dtype, single_buffer_weights=True,
            vmem_limit=vmem_limit)
    except Exception:
        # Older JAX without BlockSpec.pipeline_mode / Buffered(1): retry with
        # default (double-buffered) resident weights.
        return _mlp_forward_impl(
            x, w1, b1, w2, b2, w3, b3, tb=tb, out_num=out_num,
            out_dtype=out_dtype, single_buffer_weights=False,
            vmem_limit=vmem_limit)


def mlp_forward(x, prepared, *, tile_b=None, out_dtype=jnp.float32,
                min_pallas_rows=256):
    """Size-gated dispatch: tiny batches go to plain XLA (the Pallas path is
    pure fixed overhead there); larger batches go to the fused Pallas kernel."""
    if x.shape[0] < min_pallas_rows:
        pp, dims = prepared
        return _xla_mlp_impl(x, pp["w1"], pp["b1"], pp["w2"], pp["b2"],
                             pp["w3"], pp["b3"], out_num=dims[3],
                             out_dtype=out_dtype)
    return mlp_forward_pallas(x, prepared, tile_b=tile_b, out_dtype=out_dtype)


# --------------------------------------------------------------------------
# Init + reference
# --------------------------------------------------------------------------
def init_params(key, in_num, hidden_layers, out_num):
    """Deterministic init mimicking torch.nn.Linear (uniform(-1/sqrt(fan_in), .)).
    Weights are stored transposed vs. PyTorch: (in_features, out_features)."""
    h1, h2 = hidden_layers
    keys = jax.random.split(key, 6)

    def linear(kw, kb, fan_in, fan_out):
        bound = 1.0 / jnp.sqrt(fan_in)
        w = jax.random.uniform(kw, (fan_in, fan_out), jnp.float32, -bound, bound)
        b = jax.random.uniform(kb, (1, fan_out), jnp.float32, -bound, bound)
        return w, b

    w1, b1 = linear(keys[0], keys[1], in_num, h1)
    w2, b2 = linear(keys[2], keys[3], h1, h2)
    w3, b3 = linear(keys[4], keys[5], h2, out_num)
    return {"w1": w1, "b1": b1, "w2": w2, "b2": b2, "w3": w3, "b3": b3}


def mlp_reference(x, params):
    """Pure-JAX f32 reference for correctness checking."""
    h = _leaky_relu(x @ params["w1"] + params["b1"])
    h = _leaky_relu(h @ params["w2"] + params["b2"])
    return h @ params["w3"] + params["b3"]


# --------------------------------------------------------------------------
# Demo / self-test
# --------------------------------------------------------------------------
if __name__ == "__main__":
    key = jax.random.PRNGKey(0)
    k_params, k_x1, k_x2 = jax.random.split(key, 3)

    # Titanic-style tabular MLP: small feature count, two hidden layers, 2 outputs.
    batch, in_num, hidden_layers, out_num = 4, 8, (32, 16), 2

    params = init_params(k_params, in_num, hidden_layers, out_num)
    prepared = prepare_params(params)  # pad + bf16-cast weights ONCE

    # Small (module-spec) shape through the Pallas kernel.
    x_small = jax.random.normal(k_x1, (batch, in_num), jnp.float32)
    out_small = jax.block_until_ready(mlp_forward_pallas(x_small, prepared))
    ref_small = mlp_reference(x_small, params)
    assert out_small.shape == (batch, out_num)
    # bf16 MXU inputs with f32 accumulation -> loosened tolerance vs f32 reference.
    assert jnp.allclose(out_small, ref_small, atol=5e-2, rtol=5e-2), (
        f"max abs err {jnp.max(jnp.abs(out_small - ref_small))}")

    # Larger batch exercises the multi-step pipelined / megacore path.
    x_big = jax.random.normal(k_x2, (512, in_num), jnp.float32)
    out_big = jax.block_until_ready(mlp_forward_pallas(x_big, prepared))
    ref_big = mlp_reference(x_big, params)
    assert out_big.shape == (512, out_num)
    assert jnp.allclose(out_big, ref_big, atol=5e-2, rtol=5e-2), (
        f"max abs err {jnp.max(jnp.abs(out_big - ref_big))}")

    print("KERNEL_OK")
</pallas_src>

<mosaic_0001>
module attributes {stable_mosaic.version = 11 : i64} {
  func.func @mlp_kernel(%arg0: i32, %arg1: memref<16x128xbf16, #tpu.memory_space<vmem>>, %arg2: memref<128x128xbf16, #tpu.memory_space<vmem>>, %arg3: memref<1x128xf32, #tpu.memory_space<vmem>>, %arg4: memref<128x128xbf16, #tpu.memory_space<vmem>>, %arg5: memref<1x128xf32, #tpu.memory_space<vmem>>, %arg6: memref<128x128xbf16, #tpu.memory_space<vmem>>, %arg7: memref<1x128xf32, #tpu.memory_space<vmem>>, %arg8: memref<16x128xf32, #tpu.memory_space<vmem>>) attributes {dimension_semantics = [#tpu.dimension_semantics<parallel>], iteration_bounds = array<i64: 1>, scalar_prefetch = 0 : i64, scratch_operands = 0 : i64, tpu.core_type = #tpu.core_type<tc>, window_params = [{transform_indices = @transform_0, window_bounds = array<i64: 16, 128>}, {pipeline_mode = #tpu.pipeline_mode<synchronous>, transform_indices = @transform_1, window_bounds = array<i64: 128, 128>}, {pipeline_mode = #tpu.pipeline_mode<synchronous>, transform_indices = @transform_2, window_bounds = array<i64: 1, 128>}, {pipeline_mode = #tpu.pipeline_mode<synchronous>, transform_indices = @transform_3, window_bounds = array<i64: 128, 128>}, {pipeline_mode = #tpu.pipeline_mode<synchronous>, transform_indices = @transform_4, window_bounds = array<i64: 1, 128>}, {pipeline_mode = #tpu.pipeline_mode<synchronous>, transform_indices = @transform_5, window_bounds = array<i64: 128, 128>}, {pipeline_mode = #tpu.pipeline_mode<synchronous>, transform_indices = @transform_6, window_bounds = array<i64: 1, 128>}, {transform_indices = @transform_7, window_bounds = array<i64: 16, 128>}]} {
    %c0 = arith.constant 0 : index
    %c0_0 = arith.constant 0 : index
    %0 = vector.load %arg1[%c0, %c0_0] : memref<16x128xbf16, #tpu.memory_space<vmem>>, vector<16x128xbf16>
    %c0_1 = arith.constant 0 : index
    %c0_2 = arith.constant 0 : index
    %1 = vector.load %arg2[%c0_1, %c0_2] : memref<128x128xbf16, #tpu.memory_space<vmem>>, vector<128x128xbf16>
    %cst = arith.constant dense<0.000000e+00> : vector<16x128xf32>
    %2 = tpu.matmul %0, %1, %cst {dimension_numbers = #tpu.dot_dimension_numbers<[1], [0], [0], [1], [0, 0, 1, 1], [], []>} : vector<16x128xbf16>, vector<128x128xbf16>, vector<16x128xf32> -> vector<16x128xf32>
    %c0_3 = arith.constant 0 : index
    %c0_4 = arith.constant 0 : index
    %3 = vector.load %arg3[%c0_3, %c0_4] : memref<1x128xf32, #tpu.memory_space<vmem>>, vector<1x128xf32>
    %4 = vector.broadcast %3 : vector<1x128xf32> to vector<16x128xf32>
    %5 = arith.addf %2, %4 : vector<16x128xf32>
    %cst_5 = arith.constant 0.00999999977 : f32
    %6 = vector.broadcast %cst_5 : f32 to vector<16x128xf32>
    %7 = arith.mulf %6, %5 : vector<16x128xf32>
    %8 = arith.maximumf %5, %7 : vector<16x128xf32>
    %9 = arith.truncf %8 : vector<16x128xf32> to vector<16x128xbf16>
    %c0_6 = arith.constant 0 : index
    %c0_7 = arith.constant 0 : index
    %10 = vector.load %arg4[%c0_6, %c0_7] : memref<128x128xbf16, #tpu.memory_space<vmem>>, vector<128x128xbf16>
    %cst_8 = arith.constant dense<0.000000e+00> : vector<16x128xf32>
    %11 = tpu.matmul %9, %10, %cst_8 {dimension_numbers = #tpu.dot_dimension_numbers<[1], [0], [0], [1], [0, 0, 1, 1], [], []>} : vector<16x128xbf16>, vector<128x128xbf16>, vector<16x128xf32> -> vector<16x128xf32>
    %c0_9 = arith.constant 0 : index
    %c0_10 = arith.constant 0 : index
    %12 = vector.load %arg5[%c0_9, %c0_10] : memref<1x128xf32, #tpu.memory_space<vmem>>, vector<1x128xf32>
    %13 = vector.broadcast %12 : vector<1x128xf32> to vector<16x128xf32>
    %14 = arith.addf %11, %13 : vector<16x128xf32>
    %cst_11 = arith.constant 0.00999999977 : f32
    %15 = vector.broadcast %cst_11 : f32 to vector<16x128xf32>
    %16 = arith.mulf %15, %14 : vector<16x128xf32>
    %17 = arith.maximumf %14, %16 : vector<16x128xf32>
    %18 = arith.truncf %17 : vector<16x128xf32> to vector<16x128xbf16>
    %c0_12 = arith.constant 0 : index
    %c0_13 = arith.constant 0 : index
    %19 = vector.load %arg6[%c0_12, %c0_13] : memref<128x128xbf16, #tpu.memory_space<vmem>>, vector<128x128xbf16>
    %cst_14 = arith.constant dense<0.000000e+00> : vector<16x128xf32>
    %20 = tpu.matmul %18, %19, %cst_14 {dimension_numbers = #tpu.dot_dimension_numbers<[1], [0], [0], [1], [0, 0, 1, 1], [], []>} : vector<16x128xbf16>, vector<128x128xbf16>, vector<16x128xf32> -> vector<16x128xf32>
    %c0_15 = arith.constant 0 : index
    %c0_16 = arith.constant 0 : index
    %21 = vector.load %arg7[%c0_15, %c0_16] : memref<1x128xf32, #tpu.memory_space<vmem>>, vector<1x128xf32>
    %22 = vector.broadcast %21 : vector<1x128xf32> to vector<16x128xf32>
    %23 = arith.addf %20, %22 : vector<16x128xf32>
    %c0_17 = arith.constant 0 : index
    %c0_18 = arith.constant 0 : index
    %24 = vector.load %arg8[%c0_17, %c0_18] : memref<16x128xf32, #tpu.memory_space<vmem>>, vector<16x128xf32>
    tpu.vector_store %arg8[%c0_17, %c0_18], %23 {strides = array<i32>} : memref<16x128xf32, #tpu.memory_space<vmem>>, vector<16x128xf32>,
    return
  }
  func.func @transform_0(%arg0: i32) -> (i32, i32) {
    %c0_i32 = arith.constant 0 : i32
    %c0_i32_0 = arith.constant 0 : i32
    return %arg0, %c0_i32 : i32, i32
  }
  func.func @transform_1(%arg0: i32) -> (i32, i32) {
    %c0_i32 = arith.constant 0 : i32
    %c0_i32_0 = arith.constant 0 : i32
    %c0_i32_1 = arith.constant 0 : i32
    return %c0_i32, %c0_i32_0 : i32, i32
  }
  func.func @transform_2(%arg0: i32) -> (i32, i32) {
    %c0_i32 = arith.constant 0 : i32
    %c0_i32_0 = arith.constant 0 : i32
    %c0_i32_1 = arith.constant 0 : i32
    return %c0_i32, %c0_i32_0 : i32, i32
  }
  func.func @transform_3(%arg0: i32) -> (i32, i32) {
    %c0_i32 = arith.constant 0 : i32
    %c0_i32_0 = arith.constant 0 : i32
    %c0_i32_1 = arith.constant 0 : i32
    return %c0_i32, %c0_i32_0 : i32, i32
  }
  func.func @transform_4(%arg0: i32) -> (i32, i32) {
    %c0_i32 = arith.constant 0 : i32
    %c0_i32_0 = arith.constant 0 : i32
    %c0_i32_1 = arith.constant 0 : i32
    return %c0_i32, %c0_i32_0 : i32, i32
  }
  func.func @transform_5(%arg0: i32) -> (i32, i32) {
    %c0_i32 = arith.constant 0 : i32
    %c0_i32_0 = arith.constant 0 : i32
    %c0_i32_1 = arith.constant 0 : i32
    return %c0_i32, %c0_i32_0 : i32, i32
  }
  func.func @transform_6(%arg0: i32) -> (i32, i32) {
    %c0_i32 = arith.constant 0 : i32
    %c0_i32_0 = arith.constant 0 : i32
    %c0_i32_1 = arith.constant 0 : i32
    return %c0_i32, %c0_i32_0 : i32, i32
  }
  func.func @transform_7(%arg0: i32) -> (i32, i32) {
    %c0_i32 = arith.constant 0 : i32
    %c0_i32_0 = arith.constant 0 : i32
    return %arg0, %c0_i32 : i32, i32
  }
}

module attributes {stable_mosaic.version = 11 : i64} {
  func.func @mlp_kernel(%arg0: i32, %arg1: memref<16x128xbf16, #tpu.memory_space<vmem>>, %arg2: memref<128x128xbf16, #tpu.memory_space<vmem>>, %arg3: memref<1x128xf32, #tpu.memory_space<vmem>>, %arg4: memref<128x128xbf16, #tpu.memory_space<vmem>>, %arg5: memref<1x128xf32, #tpu.memory_space<vmem>>, %arg6: memref<128x128xbf16, #tpu.memory_space<vmem>>, %arg7: memref<1x128xf32, #tpu.memory_space<vmem>>, %arg8: memref<16x128xf32, #tpu.memory_space<vmem>>) attributes {dimension_semantics = [#tpu.dimension_semantics<parallel>], iteration_bounds = array<i64: 1>, scalar_prefetch = 0 : i64, scratch_operands = 0 : i64, tpu.core_type = #tpu.core_type<tc>, window_params = [{transform_indices = @transform_0, window_bounds = array<i64: 16, 128>}, {pipeline_mode = #tpu.pipeline_mode<synchronous>, transform_indices = @transform_1, window_bounds = array<i64: 128, 128>}, {pipeline_mode = #tpu.pipeline_mode<synchronous>, transform_indices = @transform_2, window_bounds = array<i64: 1, 128>}, {pipeline_mode = #tpu.pipeline_mode<synchronous>, transform_indices = @transform_3, window_bounds = array<i64: 128, 128>}, {pipeline_mode = #tpu.pipeline_mode<synchronous>, transform_indices = @transform_4, window_bounds = array<i64: 1, 128>}, {pipeline_mode = #tpu.pipeline_mode<synchronous>, transform_indices = @transform_5, window_bounds = array<i64: 128, 128>}, {pipeline_mode = #tpu.pipeline_mode<synchronous>, transform_indices = @transform_6, window_bounds = array<i64: 1, 128>}, {transform_indices = @transform_7, window_bounds = array<i64: 16, 128>}]} {
    %c0 = arith.constant 0 : index
    %c0_0 = arith.constant 0 : index
    %0 = vector.load %arg1[%c0, %c0_0] : memref<16x128xbf16, #tpu.memory_space<vmem>>, vector<16x128xbf16>
    %c0_1 = arith.constant 0 : index
    %c0_2 = arith.constant 0 : index
    %1 = vector.load %arg2[%c0_1, %c0_2] : memref<128x128xbf16, #tpu.memory_space<vmem>>, vector<128x128xbf16>
    %cst = arith.constant dense<0.000000e+00> : vector<16x128xf32>
    %2 = tpu.matmul %0, %1, %cst {dimension_numbers = #tpu.dot_dimension_numbers<[1], [0], [0], [1], [0, 0, 1, 1], [], []>} : vector<16x128xbf16>, vector<128x128xbf16>, vector<16x128xf32> -> vector<16x128xf32>
    %c0_3 = arith.constant 0 : index
    %c0_4 = arith.constant 0 : index
    %3 = vector.load %arg3[%c0_3, %c0_4] : memref<1x128xf32, #tpu.memory_space<vmem>>, vector<1x128xf32>
    %4 = vector.broadcast %3 : vector<1x128xf32> to vector<16x128xf32>
    %5 = arith.addf %2, %4 : vector<16x128xf32>
    %cst_5 = arith.constant 0.00999999977 : f32
    %6 = vector.broadcast %cst_5 : f32 to vector<16x128xf32>
    %7 = arith.mulf %6, %5 : vector<16x128xf32>
    %8 = arith.maximumf %5, %7 : vector<16x128xf32>
    %9 = arith.truncf %8 : vector<16x128xf32> to vector<16x128xbf16>
    %c0_6 = arith.constant 0 : index
    %c0_7 = arith.constant 0 : index
    %10 = vector.load %arg4[%c0_6, %c0_7] : memref<128x128xbf16, #tpu.memory_space<vmem>>, vector<128x128xbf16>
    %cst_8 = arith.constant dense<0.000000e+00> : vector<16x128xf32>
    %11 = tpu.matmul %9, %10, %cst_8 {dimension_numbers = #tpu.dot_dimension_numbers<[1], [0], [0], [1], [0, 0, 1, 1], [], []>} : vector<16x128xbf16>, vector<128x128xbf16>, vector<16x128xf32> -> vector<16x128xf32>
    %c0_9 = arith.constant 0 : index
    %c0_10 = arith.constant 0 : index
    %12 = vector.load %arg5[%c0_9, %c0_10] : memref<1x128xf32, #tpu.memory_space<vmem>>, vector<1x128xf32>
    %13 = vector.broadcast %12 : vector<1x128xf32> to vector<16x128xf32>
    %14 = arith.addf %11, %13 : vector<16x128xf32>
    %cst_11 = arith.constant 0.00999999977 : f32
    %15 = vector.broadcast %cst_11 : f32 to vector<16x128xf32>
    %16 = arith.mulf %15, %14 : vector<16x128xf32>
    %17 = arith.maximumf %14, %16 : vector<16x128xf32>
    %18 = arith.truncf %17 : vector<16x128xf32> to vector<16x128xbf16>
    %c0_12 = arith.constant 0 : index
    %c0_13 = arith.constant 0 : index
    %19 = vector.load %arg6[%c0_12, %c0_13] : memref<128x128xbf16, #tpu.memory_space<vmem>>, vector<128x128xbf16>
    %cst_14 = arith.constant dense<0.000000e+00> : vector<16x128xf32>
    %20 = tpu.matmul %18, %19, %cst_14 {dimension_numbers = #tpu.dot_dimension_numbers<[1], [0], [0], [1], [0, 0, 1, 1], [], []>} : vector<16x128xbf16>, vector<128x128xbf16>, vector<16x128xf32> -> vector<16x128xf32>
    %c0_15 = arith.constant 0 : index
    %c0_16 = arith.constant 0 : index
    %21 = vector.load %arg7[%c0_15, %c0_16] : memref<1x128xf32, #tpu.memory_space<vmem>>, vector<1x128xf32>
    %22 = vector.broadcast %21 : vector<1x128xf32> to vector<16x128xf32>
    %23 = arith.addf %20, %22 : vector<16x128xf32>
    %c0_17 = arith.constant 0 : index
    %c0_18 = arith.constant 0 : index
    %24 = vector.load %arg8[%c0_17, %c0_18] : memref<16x128xf32, #tpu.memory_space<vmem>>, vector<16x128xf32>
    tpu.vector_store %arg8[%c0_17, %c0_18], %23 {strides = array<i32>} : memref<16x128xf32, #tpu.memory_space<vmem>>, vector<16x128xf32>,
    return
  }
  func.func @transform_0(%arg0: i32) -> (i32, i32) {
    %c0_i32 = arith.constant 0 : i32
    %c0_i32_0 = arith.constant 0 : i32
    return %arg0, %c0_i32 : i32, i32
  }
  func.func @transform_1(%arg0: i32) -> (i32, i32) {
    %c0_i32 = arith.constant 0 : i32
    %c0_i32_0 = arith.constant 0 : i32
    %c0_i32_1 = arith.constant 0 : i32
    return %c0_i32, %c0_i32_0 : i32, i32
  }
  func.func @transform_2(%arg0: i32) -> (i32, i32) {
    %c0_i32 = arith.constant 0 : i32
    %c0_i32_0 = arith.constant 0 : i32
    %c0_i32_1 = arith.constant 0 : i32
    return %c0_i32, %c0_i32_0 : i32, i32
  }
  func.func @transform_3(%arg0: i32) -> (i32, i32) {
    %c0_i32 = arith.constant 0 : i32
    %c0_i32_0 = arith.constant 0 : i32
    %c0_i32_1 = arith.constant 0 : i32
    return %c0_i32, %c0_i32_0 : i32, i32
  }
  func.func @transform_4(%arg0: i32) -> (i32, i32) {
    %c0_i32 = arith.constant 0 : i32
    %c0_i32_0 = arith.constant 0 : i32
    %c0_i32_1 = arith.constant 0 : i32
    return %c0_i32, %c0_i32_0 : i32, i32
  }
  func.func @transform_5(%arg0: i32) -> (i32, i32) {
    %c0_i32 = arith.constant 0 : i32
    %c0_i32_0 = arith.constant 0 : i32
    %c0_i32_1 = arith.constant 0 : i32
    return %c0_i32, %c0_i32_0 : i32, i32
  }
  func.func @transform_6(%arg0: i32) -> (i32, i32) {
    %c0_i32 = arith.constant 0 : i32
    %c0_i32_0 = arith.constant 0 : i32
    %c0_i32_1 = arith.constant 0 : i32
    return %c0_i32, %c0_i32_0 : i32, i32
  }
  func.func @transform_7(%arg0: i32) -> (i32, i32) {
    %c0_i32 = arith.constant 0 : i32
    %c0_i32_0 = arith.constant 0 : i32
    return %arg0, %c0_i32 : i32, i32
  }
}

</mosaic_0001>

<bundles_post_ra>
// kernel: _mlp_forward_impl.1
= control target key start
LH: loop header
LB: loop body
LE: loop exit
PB: predicated region body
PF: predicated region fallthrough
CT: control target
= control target key end

     0   :  { %12 = vsyncpa [#allocation3], 0  ;;  %s794_s0 = inlined_call_operand.vmem [shape: bf16[16,128], index: 0, kind: input, shape index: {}]   ;;  %s795_s1 = inlined_call_operand.hbm [shape: bf16[128,128], index: 1, kind: input, shape index: {}]   ;;  %s796_s2 = inlined_call_operand.vmem [shape: f32[1,128], index: 2, kind: input, shape index: {}]   ;;  %s797_s3 = inlined_call_operand.hbm [shape: bf16[128,128], index: 3, kind: input, shape index: {}]   ;;  %s798_s4 = inlined_call_operand.vmem [shape: f32[1,128], index: 4, kind: input, shape index: {}]   ;;  %s799_s5 = inlined_call_operand.hbm [shape: bf16[128,128], index: 5, kind: input, shape index: {}]   ;;  %s800_s6 = inlined_call_operand.vmem [shape: f32[1,128], index: 6, kind: input, shape index: {}]   ;;  %s801_s7 = inlined_call_operand.vmem [shape: f32[16,128], index: 7, kind: output, shape index: {}]  }
   0x1   :  { %13 = vsyncpa [#allocation5], 0  ;;  %s647_s24 = smov [#allocation4]   ;;  %s648_s26 = smov [#allocation2]  }
   0x2   :  { %s35_s25 = sshll.u32 %s647_s24, 4  ;;  %s21_s27 = sshll.u32 %s648_s26, 4  ;;  %s36_s25 = int_to_ptr.vmem [resolvable:$true] %s35_s25  ;;  %s694_s27 = int_to_ptr.vmem [resolvable:$true] %s21_s27 }
   0x3   :  { %s577_s30 = scalar_lea.hbm %s797_s3, 1024 }
   0x4   :  { %p578_p0 = scmp.ne.s32.totalorder %s797_s3, %s577_s30  ;;  %p581_p1 = scmp.lt.u32.totalorder %s577_s30, %s797_s3 }
   0x6   :  { %p583_p2 = pnand %p581_p1, %p578_p0 }
   0x8   :  { %586 = shalt.err (!%p583_p2)
}
   0x9   :  { %s587_s12 = scalar_lea.vmem %s36_s25, 1024  ;;  %p592_p4 = scmp.lt.s32.totalorder %s36_s25, %s36_s25 }
   0xa   :  { %p588_p3 = scmp.ne.s32.totalorder %s36_s25, %s587_s12  ;;  %p593_p5 = scmp.lt.s32.totalorder %s587_s12, %s587_s12 }
   0xc   :  { %p594_p6 = por %p593_p5, %p592_p4 }
   0xe   :  { %p595_p7 = pnand %p594_p6, %p588_p3 }
  0x10   :  { %598 = shalt.err (!%p595_p7)
}
  0x11   :  { %s649_s13 = smov 64   ;;  %s650_s14 = smov 4  }
  0x12   :  { %41 = dma.hbm_to_vmem [thread:$0]  %s797_s3, 1024, %s36_s25, [#allocation5], %s649_s13, %s649_s13, %s650_s14  }
  0x13   :  { %s599_s19 = scalar_lea.hbm %s795_s1, 1024 }
  0x14   :  { %p600_p8 = scmp.ne.s32.totalorder %s795_s1, %s599_s19  ;;  %p603_p9 = scmp.lt.u32.totalorder %s599_s19, %s795_s1 }
  0x16   :  { %p605_p10 = pnand %p603_p9, %p600_p8 }
  0x18   :  { %608 = shalt.err (!%p605_p10)
}
  0x19   :  { %s609_s24 = scalar_lea.vmem %s694_s27, 1024  ;;  %p614_p12 = scmp.lt.s32.totalorder %s694_s27, %s694_s27 }
  0x1a   :  { %p610_p11 = scmp.ne.s32.totalorder %s694_s27, %s609_s24  ;;  %p615_p13 = scmp.lt.s32.totalorder %s609_s24, %s609_s24 }
  0x1c   :  { %p616_p0 = por %p615_p13, %p614_p12 }
  0x1e   :  { %p617_p1 = pnand %p616_p0, %p610_p11 }
  0x20   :  { %620 = shalt.err (!%p617_p1)
}
  0x21   :  { %27 = dma.hbm_to_vmem [thread:$0]  %s795_s1, 1024, %s694_s27, [#allocation3], %s649_s13, %s649_s13, %s650_s14  }
  0x22   :  { %s651_s26 = smov [#allocation6]   ;;  %s621_s8 = scalar_lea.hbm %s799_s5, 1024 }
  0x23   :  { %s49_s28 = sshll.u32 %s651_s26, 4  ;;  %p622_p2 = scmp.ne.s32.totalorder %s799_s5, %s621_s8  ;;  %s50_s28 = int_to_ptr.vmem [resolvable:$true] %s49_s28 }
  0x24   :  { %p625_p3 = scmp.lt.u32.totalorder %s621_s8, %s799_s5 }
  0x26   :  { %p627_p4 = pnand %p625_p3, %p622_p2 }
  0x28   :  { %630 = shalt.err (!%p627_p4)
}
  0x29   :  { %s631_s15 = scalar_lea.vmem %s50_s28, 1024  ;;  %p636_p6 = scmp.lt.s32.totalorder %s50_s28, %s50_s28 }
  0x2a   :  { %p632_p5 = scmp.ne.s32.totalorder %s50_s28, %s631_s15  ;;  %p637_p7 = scmp.lt.s32.totalorder %s631_s15, %s631_s15 }
  0x2c   :  { %p638_p8 = por %p637_p7, %p636_p6 }
  0x2e   :  { %p639_p9 = pnand %p638_p8, %p632_p5 }
  0x30   :  { %642 = shalt.err (!%p639_p9)
}
  0x31   :  { %55 = dma.hbm_to_vmem [thread:$0]  %s799_s5, 1024, %s50_s28, [#allocation5], %s649_s13, %s649_s13, %s650_s14  }
  0x32   :  { %643 = dma.done.wait [#allocation3], 1024  }
  0x33   :  { %644 = vsyncadd [#allocation3], 4294966272 }
  0x34   :  { %645 = dma.done.wait [#allocation5], 2048  }
  0x35   :  { %646 = vsyncadd [#allocation5], 4294965248  ;;  %v652_v0 = vmov 0.0   ;;  %vm653_vm0 = vmmov 0   ;;  %v552_v1 = vld [vmem:[#allocation2] sm:$0xff]   ;;  %v553_v2 = vld [vmem:[#allocation2 + $0x8] sm:$0xff]  }
  0x36   :  { %485 = vmatprep.subr.bf16.mxu0 %v652_v0  ;;  %501 = vmatprep.mubr.msk.bf16.mxu0 %vm653_vm0, %v652_v0  ;;  %v554_v3 = vld [vmem:[#allocation2 + $0x10] sm:$0xff]   ;;  %v561_v4 = vld [vmem:[#allocation4] sm:$0xff]   ;;  %v555_v5 = vld [vmem:[#allocation2 + $0x18] sm:$0xff]  }
  0x37   :  { %505 = vmatprep.subr.bf16.mxu1 %v652_v0  ;;  %521 = vmatprep.mubr.msk.bf16.mxu1 %vm653_vm0, %v652_v0  ;;  %v562_v6 = vld [vmem:[#allocation4 + $0x8] sm:$0xff]   ;;  %v556_v7 = vld [vmem:[#allocation2 + $0x20] sm:$0xff]   ;;  %v563_v8 = vld [vmem:[#allocation4 + $0x10] sm:$0xff]  }
  0x38   :  { %486 = vmatpush3.bf16.msra.mxu0 %v552_v1  ;;  %506 = vmatpush3.bf16.msra.mxu1 %v561_v4  ;;  %v557_v9 = vld [vmem:[#allocation2 + $0x28] sm:$0xff]   ;;  %v564_v10 = vld [vmem:[#allocation4 + $0x18] sm:$0xff]   ;;  %v558_v11 = vld [vmem:[#allocation2 + $0x30] sm:$0xff]  }
  0x39   :  { %487 = vmatprep.subr.bf16.mxu0 %v652_v0  ;;  %507 = vmatprep.subr.bf16.mxu1 %v652_v0  ;;  %v565_v12 = vld [vmem:[#allocation4 + $0x20] sm:$0xff]   ;;  %v559_v13 = vld [vmem:[#allocation2 + $0x38] sm:$0xff]   ;;  %v566_v15 = vld [vmem:[#allocation4 + $0x28] sm:$0xff]  }
  0x3a   :  { %v560_v14 = vld [vmem:[%s794_s0] sm:$0xff]   ;;  %v567_v16 = vld [vmem:[#allocation4 + $0x30] sm:$0xff]   ;;  %v568_v17 = vld [vmem:[#allocation4 + $0x38] sm:$0xff]  }
  0x3b   :  { %v569_v18 = vld [vmem:[#allocation6] sm:$0xff]   ;;  %v570_v19 = vld [vmem:[#allocation6 + $0x8] sm:$0xff]   ;;  %v571_v20 = vld [vmem:[#allocation6 + $0x10] sm:$0xff]  }
  0x3c   :  { %488 = vmatpush3.bf16.msra.mxu0 %v553_v2  ;;  %508 = vmatpush3.bf16.msra.mxu1 %v562_v6  ;;  %v572_v21 = vld [vmem:[#allocation6 + $0x18] sm:$0xff]   ;;  %v573_v22 = vld [vmem:[#allocation6 + $0x20] sm:$0xff]   ;;  %v574_v35 = vld [vmem:[#allocation6 + $0x28] sm:$0xff]  }
  0x3d   :  { %489 = vmatprep.subr.bf16.mxu0 %v652_v0  ;;  %509 = vmatprep.subr.bf16.mxu1 %v652_v0  ;;  %v430_v23 = vld [vmem:[%s796_s2] ss:$0 sm:$0xff]  ;;  %v575_v36 = vld [vmem:[#allocation6 + $0x30] sm:$0xff]   ;;  %v576_v37 = vld [vmem:[#allocation6 + $0x38] sm:$0xff]  }
  0x3e   :  { %v440_v38 = vld [vmem:[%s798_s4] ss:$0 sm:$0xff] }
  0x3f   :  { %v449_v50 = vld [vmem:[%s800_s6] ss:$0 sm:$0xff] }
  0x40   :  { %490 = vmatpush3.bf16.msra.mxu0 %v554_v3  ;;  %510 = vmatpush3.bf16.msra.mxu1 %v563_v8 }
  0x41   :  { %491 = vmatprep.subr.bf16.mxu0 %v652_v0  ;;  %511 = vmatprep.subr.bf16.mxu1 %v652_v0 }
  0x44   :  { %492 = vmatpush3.bf16.msra.mxu0 %v555_v5  ;;  %512 = vmatpush3.bf16.msra.mxu1 %v564_v10 }
  0x45   :  { %493 = vmatprep.subr.bf16.mxu0 %v652_v0  ;;  %513 = vmatprep.subr.bf16.mxu1 %v652_v0 }
  0x48   :  { %494 = vmatpush3.bf16.msra.mxu0 %v556_v7  ;;  %514 = vmatpush3.bf16.msra.mxu1 %v565_v12 }
  0x49   :  { %495 = vmatprep.subr.bf16.mxu0 %v652_v0  ;;  %515 = vmatprep.subr.bf16.mxu1 %v652_v0 }
  0x4c   :  { %496 = vmatpush3.bf16.msra.mxu0 %v557_v9  ;;  %516 = vmatpush3.bf16.msra.mxu1 %v566_v15 }
  0x4d   :  { %497 = vmatprep.subr.bf16.mxu0 %v652_v0  ;;  %517 = vmatprep.subr.bf16.mxu1 %v652_v0 }
  0x50   :  { %498 = vmatpush3.bf16.msra.mxu0 %v558_v11  ;;  %518 = vmatpush3.bf16.msra.mxu1 %v567_v16 }
  0x51   :  { %499 = vmatprep.subr.bf16.mxu0 %v652_v0  ;;  %519 = vmatprep.subr.bf16.mxu1 %v652_v0 }
  0x54   :  { %500 = vmatpush3.bf16.msra.mxu0 %v559_v13  ;;  %520 = vmatpush3.bf16.msra.mxu1 %v568_v17 }
  0x55   :  { %525 = vmatprep.subr.bf16.mxu0 %v652_v0 }
  0x57   :  { %502 = vmatmul.mubr.bf16.vlgmr.msra.gmra.mrb[0].mxu0 %v560_v14 }
  0x58   :  { %541 = vmatprep.mubr.msk.bf16.mxu0 %vm653_vm0, %v652_v0  ;;  %526 = vmatpush3.bf16.msra.mxu0 %v569_v18 }
  0x59   :  { %527 = vmatprep.subr.bf16.mxu0 %v652_v0 }
  0x5c   :  { %528 = vmatpush3.bf16.msra.mxu0 %v570_v19 }
  0x5d   :  { %529 = vmatprep.subr.bf16.mxu0 %v652_v0 }
  0x60   :  { %530 = vmatpush3.bf16.msra.mxu0 %v571_v20 }
  0x61   :  { %531 = vmatprep.subr.bf16.mxu0 %v652_v0 }
  0x64   :  { %532 = vmatpush3.bf16.msra.mxu0 %v572_v21 }
  0x65   :  { %533 = vmatprep.subr.bf16.mxu0 %v652_v0 }
  0x68   :  { %534 = vmatpush3.bf16.msra.mxu0 %v573_v22 }
  0x69   :  { %535 = vmatprep.subr.bf16.mxu0 %v652_v0 }
  0x6c   :  { %536 = vmatpush3.bf16.msra.mxu0 %v574_v35 }
  0x6d   :  { %537 = vmatprep.subr.bf16.mxu0 %v652_v0 }
  0x70   :  { %538 = vmatpush3.bf16.msra.mxu0 %v575_v36 }
  0x71   :  { %539 = vmatprep.subr.bf16.mxu0 %v652_v0 }
  0x74   :  { %540 = vmatpush3.bf16.msra.mxu0 %v576_v37 }
 0x12a   :  { %v181_v24 = vpop.f32.mrb[0].mxu0 }
 0x12b   :  { %v182_v25 = vadd.f32 %v430_v23, %v181_v24  ;;  %v503_v26 = vpop.f32.mrb[1].mxu0 }
 0x12c   :  { %v184_v27 = vpop.f32.mrb[2].mxu0 }
 0x12d   :  { %v188_v28 = vmul.f32 0.01, %v182_v25  ;;  %v185_v29 = vadd.f32 %v430_v23, %v184_v27  ;;  %v504_v30 = vpop.f32.mrb[3].mxu0 }
 0x12f   :  { %v189_v31 = vmul.f32 0.01, %v185_v29  ;;  %v190_v32 = vmax.f32 %v182_v25, %v188_v28 }
 0x131   :  { %v191_v33 = vmax.f32 %v185_v29, %v189_v31 }
 0x133   :  { %v192_v34 = vpack.c.bf16 %v191_v33, %v190_v32 }
 0x135   :  { %522 = vmatmul.mubr.bf16.vlgmr.msra.gmra.mrb[0].mxu1 %v192_v34 }
 0x208   :  { %v298_v39 = vpop.f32.mrb[0].mxu1 }
 0x209   :  { %v299_v40 = vadd.f32 %v440_v38, %v298_v39  ;;  %v523_v41 = vpop.f32.mrb[1].mxu1 }
 0x20a   :  { %v301_v42 = vpop.f32.mrb[2].mxu1 }
 0x20b   :  { %v305_v43 = vmul.f32 0.01, %v299_v40  ;;  %v302_v44 = vadd.f32 %v440_v38, %v301_v42  ;;  %v524_v45 = vpop.f32.mrb[3].mxu1 }
 0x20d   :  { %v306_v46 = vmul.f32 0.01, %v302_v44  ;;  %v307_v47 = vmax.f32 %v299_v40, %v305_v43 }
 0x20f   :  { %v308_v48 = vmax.f32 %v302_v44, %v306_v46 }
 0x211   :  { %v309_v49 = vpack.c.bf16 %v308_v48, %v307_v47 }
 0x213   :  { %542 = vmatmul.mubr.bf16.vlgmr.msra.gmra.mrb[4].mxu0 %v309_v49 }
 0x2e6   :  { %v415_v51 = vpop.f32.mrb[4].mxu0 }
 0x2e7   :  { %v416_v52 = vadd.f32 %v449_v50, %v415_v51  ;;  %v543_v53 = vpop.f32.mrb[5].mxu0 }
 0x2e8   :  { %v418_v54 = vpop.f32.mrb[6].mxu0 }
 0x2e9   :  { %422 = vst [vmem:[%s801_s7] sm:$0xff] %v416_v52  ;;  %v419_v55 = vadd.f32 %v449_v50, %v418_v54  ;;  %v544_v56 = vpop.f32.mrb[7].mxu0 }
 0x2eb   :  { %423 = vst [vmem:[%s801_s7 + $0x8] sm:$0xff] %v419_v55 }
 0x2ec   :  { %428 = vsyncpa [#allocation3], 1 }
 0x2ed   :  { %429 = vsyncpa [#allocation5], 1 }

// kernel: _mlp_forward_impl.1
= control target key start
LH: loop header
LB: loop body
LE: loop exit
PB: predicated region body
PF: predicated region fallthrough
CT: control target
= control target key end

     0   :  { %12 = vsyncpa [#allocation3], 0  ;;  %s794_s0 = inlined_call_operand.vmem [shape: bf16[16,128], index: 0, kind: input, shape index: {}]   ;;  %s795_s1 = inlined_call_operand.hbm [shape: bf16[128,128], index: 1, kind: input, shape index: {}]   ;;  %s796_s2 = inlined_call_operand.vmem [shape: f32[1,128], index: 2, kind: input, shape index: {}]   ;;  %s797_s3 = inlined_call_operand.hbm [shape: bf16[128,128], index: 3, kind: input, shape index: {}]   ;;  %s798_s4 = inlined_call_operand.vmem [shape: f32[1,128], index: 4, kind: input, shape index: {}]   ;;  %s799_s5 = inlined_call_operand.hbm [shape: bf16[128,128], index: 5, kind: input, shape index: {}]   ;;  %s800_s6 = inlined_call_operand.vmem [shape: f32[1,128], index: 6, kind: input, shape index: {}]   ;;  %s801_s7 = inlined_call_operand.vmem [shape: f32[16,128], index: 7, kind: output, shape index: {}]  }
   0x1   :  { %13 = vsyncpa [#allocation5], 0  ;;  %s647_s24 = smov [#allocation4]   ;;  %s648_s26 = smov [#allocation2]  }
   0x2   :  { %s35_s25 = sshll.u32 %s647_s24, 4  ;;  %s21_s27 = sshll.u32 %s648_s26, 4  ;;  %s36_s25 = int_to_ptr.vmem [resolvable:$true] %s35_s25  ;;  %s694_s27 = int_to_ptr.vmem [resolvable:$true] %s21_s27 }
   0x3   :  { %s577_s30 = scalar_lea.hbm %s797_s3, 1024 }
   0x4   :  { %p578_p0 = scmp.ne.s32.totalorder %s797_s3, %s577_s30  ;;  %p581_p1 = scmp.lt.u32.totalorder %s577_s30, %s797_s3 }
   0x6   :  { %p583_p2 = pnand %p581_p1, %p578_p0 }
   0x8   :  { %586 = shalt.err (!%p583_p2)
}
   0x9   :  { %s587_s12 = scalar_lea.vmem %s36_s25, 1024  ;;  %p592_p4 = scmp.lt.s32.totalorder %s36_s25, %s36_s25 }
   0xa   :  { %p588_p3 = scmp.ne.s32.totalorder %s36_s25, %s587_s12  ;;  %p593_p5 = scmp.lt.s32.totalorder %s587_s12, %s587_s12 }
   0xc   :  { %p594_p6 = por %p593_p5, %p592_p4 }
   0xe   :  { %p595_p7 = pnand %p594_p6, %p588_p3 }
  0x10   :  { %598 = shalt.err (!%p595_p7)
}
  0x11   :  { %s649_s13 = smov 64   ;;  %s650_s14 = smov 4  }
  0x12   :  { %41 = dma.hbm_to_vmem [thread:$0]  %s797_s3, 1024, %s36_s25, [#allocation5], %s649_s13, %s649_s13, %s650_s14  }
  0x13   :  { %s599_s19 = scalar_lea.hbm %s795_s1, 1024 }
  0x14   :  { %p600_p8 = scmp.ne.s32.totalorder %s795_s1, %s599_s19  ;;  %p603_p9 = scmp.lt.u32.totalorder %s599_s19, %s795_s1 }
  0x16   :  { %p605_p10 = pnand %p603_p9, %p600_p8 }
  0x18   :  { %608 = shalt.err (!%p605_p10)
}
  0x19   :  { %s609_s24 = scalar_lea.vmem %s694_s27, 1024  ;;  %p614_p12 = scmp.lt.s32.totalorder %s694_s27, %s694_s27 }
  0x1a   :  { %p610_p11 = scmp.ne.s32.totalorder %s694_s27, %s609_s24  ;;  %p615_p13 = scmp.lt.s32.totalorder %s609_s24, %s609_s24 }
  0x1c   :  { %p616_p0 = por %p615_p13, %p614_p12 }
  0x1e   :  { %p617_p1 = pnand %p616_p0, %p610_p11 }
  0x20   :  { %620 = shalt.err (!%p617_p1)
}
  0x21   :  { %27 = dma.hbm_to_vmem [thread:$0]  %s795_s1, 1024, %s694_s27, [#allocation3], %s649_s13, %s649_s13, %s650_s14  }
  0x22   :  { %s651_s26 = smov [#allocation6]   ;;  %s621_s8 = scalar_lea.hbm %s799_s5, 1024 }
  0x23   :  { %s49_s28 = sshll.u32 %s651_s26, 4  ;;  %p622_p2 = scmp.ne.s32.totalorder %s799_s5, %s621_s8  ;;  %s50_s28 = int_to_ptr.vmem [resolvable:$true] %s49_s28 }
  0x24   :  { %p625_p3 = scmp.lt.u32.totalorder %s621_s8, %s799_s5 }
  0x26   :  { %p627_p4 = pnand %p625_p3, %p622_p2 }
  0x28   :  { %630 = shalt.err (!%p627_p4)
}
  0x29   :  { %s631_s15 = scalar_lea.vmem %s50_s28, 1024  ;;  %p636_p6 = scmp.lt.s32.totalorder %s50_s28, %s50_s28 }
  0x2a   :  { %p632_p5 = scmp.ne.s32.totalorder %s50_s28, %s631_s15  ;;  %p637_p7 = scmp.lt.s32.totalorder %s631_s15, %s631_s15 }
  0x2c   :  { %p638_p8 = por %p637_p7, %p636_p6 }
  0x2e   :  { %p639_p9 = pnand %p638_p8, %p632_p5 }
  0x30   :  { %642 = shalt.err (!%p639_p9)
}
  0x31   :  { %55 = dma.hbm_to_vmem [thread:$0]  %s799_s5, 1024, %s50_s28, [#allocation5], %s649_s13, %s649_s13, %s650_s14  }
  0x32   :  { %643 = dma.done.wait [#allocation3], 1024  }
  0x33   :  { %644 = vsyncadd [#allocation3], 4294966272 }
  0x34   :  { %645 = dma.done.wait [#allocation5], 2048  }
  0x35   :  { %646 = vsyncadd [#allocation5], 4294965248  ;;  %v652_v0 = vmov 0.0   ;;  %vm653_vm0 = vmmov 0   ;;  %v552_v1 = vld [vmem:[#allocation2] sm:$0xff]   ;;  %v553_v2 = vld [vmem:[#allocation2 + $0x8] sm:$0xff]  }
  0x36   :  { %485 = vmatprep.subr.bf16.mxu0 %v652_v0  ;;  %501 = vmatprep.mubr.msk.bf16.mxu0 %vm653_vm0, %v652_v0  ;;  %v554_v3 = vld [vmem:[#allocation2 + $0x10] sm:$0xff]   ;;  %v561_v4 = vld [vmem:[#allocation4] sm:$0xff]   ;;  %v555_v5 = vld [vmem:[#allocation2 + $0x18] sm:$0xff]  }
  0x37   :  { %505 = vmatprep.subr.bf16.mxu1 %v652_v0  ;;  %521 = vmatprep.mubr.msk.bf16.mxu1 %vm653_vm0, %v652_v0  ;;  %v562_v6 = vld [vmem:[#allocation4 + $0x8] sm:$0xff]   ;;  %v556_v7 = vld [vmem:[#allocation2 + $0x20] sm:$0xff]   ;;  %v563_v8 = vld [vmem:[#allocation4 + $0x10] sm:$0xff]  }
  0x38   :  { %486 = vmatpush3.bf16.msra.mxu0 %v552_v1  ;;  %506 = vmatpush3.bf16.msra.mxu1 %v561_v4  ;;  %v557_v9 = vld [vmem:[#allocation2 + $0x28] sm:$0xff]   ;;  %v564_v10 = vld [vmem:[#allocation4 + $0x18] sm:$0xff]   ;;  %v558_v11 = vld [vmem:[#allocation2 + $0x30] sm:$0xff]  }
  0x39   :  { %487 = vmatprep.subr.bf16.mxu0 %v652_v0  ;;  %507 = vmatprep.subr.bf16.mxu1 %v652_v0  ;;  %v565_v12 = vld [vmem:[#allocation4 + $0x20] sm:$0xff]   ;;  %v559_v13 = vld [vmem:[#allocation2 + $0x38] sm:$0xff]   ;;  %v566_v15 = vld [vmem:[#allocation4 + $0x28] sm:$0xff]  }
  0x3a   :  { %v560_v14 = vld [vmem:[%s794_s0] sm:$0xff]   ;;  %v567_v16 = vld [vmem:[#allocation4 + $0x30] sm:$0xff]   ;;  %v568_v17 = vld [vmem:[#allocation4 + $0x38] sm:$0xff]  }
  0x3b   :  { %v569_v18 = vld [vmem:[#allocation6] sm:$0xff]   ;;  %v570_v19 = vld [vmem:[#allocation6 + $0x8] sm:$0xff]   ;;  %v571_v20 = vld [vmem:[#allocation6 + $0x10] sm:$0xff]  }
  0x3c   :  { %488 = vmatpush3.bf16.msra.mxu0 %v553_v2  ;;  %508 = vmatpush3.bf16.msra.mxu1 %v562_v6  ;;  %v572_v21 = vld [vmem:[#allocation6 + $0x18] sm:$0xff]   ;;  %v573_v22 = vld [vmem:[#allocation6 + $0x20] sm:$0xff]   ;;  %v574_v35 = vld [vmem:[#allocation6 + $0x28] sm:$0xff]  }
  0x3d   :  { %489 = vmatprep.subr.bf16.mxu0 %v652_v0  ;;  %509 = vmatprep.subr.bf16.mxu1 %v652_v0  ;;  %v430_v23 = vld [vmem:[%s796_s2] ss:$0 sm:$0xff]  ;;  %v575_v36 = vld [vmem:[#allocation6 + $0x30] sm:$0xff]   ;;  %v576_v37 = vld [vmem:[#allocation6 + $0x38] sm:$0xff]  }
  0x3e   :  { %v440_v38 = vld [vmem:[%s798_s4] ss:$0 sm:$0xff] }
  0x3f   :  { %v449_v50 = vld [vmem:[%s800_s6] ss:$0 sm:$0xff] }
  0x40   :  { %490 = vmatpush3.bf16.msra.mxu0 %v554_v3  ;;  %510 = vmatpush3.bf16.msra.mxu1 %v563_v8 }
  0x41   :  { %491 = vmatprep.subr.bf16.mxu0 %v652_v0  ;;  %511 = vmatprep.subr.bf16.mxu1 %v652_v0 }
  0x44   :  { %492 = vmatpush3.bf16.msra.mxu0 %v555_v5  ;;  %512 = vmatpush3.bf16.msra.mxu1 %v564_v10 }
  0x45   :  { %493 = vmatprep.subr.bf16.mxu0 %v652_v0  ;;  %513 = vmatprep.subr.bf16.mxu1 %v652_v0 }
  0x48   :  { %494 = vmatpush3.bf16.msra.mxu0 %v556_v7  ;;  %514 = vmatpush3.bf16.msra.mxu1 %v565_v12 }
  0x49   :  { %495 = vmatprep.subr.bf16.mxu0 %v652_v0  ;;  %515 = vmatprep.subr.bf16.mxu1 %v652_v0 }
  0x4c   :  { %496 = vmatpush3.bf16.msra.mxu0 %v557_v9  ;;  %516 = vmatpush3.bf16.msra.mxu1 %v566_v15 }
  0x4d   :  { %497 = vmatprep.subr.bf16.mxu0 %v652_v0  ;;  %517 = vmatprep.subr.bf16.mxu1 %v652_v0 }
  0x50   :  { %498 = vmatpush3.bf16.msra.mxu0 %v558_v11  ;;  %518 = vmatpush3.bf16.msra.mxu1 %v567_v16 }
  0x51   :  { %499 = vmatprep.subr.bf16.mxu0 %v652_v0  ;;  %519 = vmatprep.subr.bf16.mxu1 %v652_v0 }
  0x54   :  { %500 = vmatpush3.bf16.msra.mxu0 %v559_v13  ;;  %520 = vmatpush3.bf16.msra.mxu1 %v568_v17 }
  0x55   :  { %525 = vmatprep.subr.bf16.mxu0 %v652_v0 }
  0x57   :  { %502 = vmatmul.mubr.bf16.vlgmr.msra.gmra.mrb[0].mxu0 %v560_v14 }
  0x58   :  { %541 = vmatprep.mubr.msk.bf16.mxu0 %vm653_vm0, %v652_v0  ;;  %526 = vmatpush3.bf16.msra.mxu0 %v569_v18 }
  0x59   :  { %527 = vmatprep.subr.bf16.mxu0 %v652_v0 }
  0x5c   :  { %528 = vmatpush3.bf16.msra.mxu0 %v570_v19 }
  0x5d   :  { %529 = vmatprep.subr.bf16.mxu0 %v652_v0 }
  0x60   :  { %530 = vmatpush3.bf16.msra.mxu0 %v571_v20 }
  0x61   :  { %531 = vmatprep.subr.bf16.mxu0 %v652_v0 }
  0x64   :  { %532 = vmatpush3.bf16.msra.mxu0 %v572_v21 }
  0x65   :  { %533 = vmatprep.subr.bf16.mxu0 %v652_v0 }
  0x68   :  { %534 = vmatpush3.bf16.msra.mxu0 %v573_v22 }
  0x69   :  { %535 = vmatprep.subr.bf16.mxu0 %v652_v0 }
  0x6c   :  { %536 = vmatpush3.bf16.msra.mxu0 %v574_v35 }
  0x6d   :  { %537 = vmatprep.subr.bf16.mxu0 %v652_v0 }
  0x70   :  { %538 = vmatpush3.bf16.msra.mxu0 %v575_v36 }
  0x71   :  { %539 = vmatprep.subr.bf16.mxu0 %v652_v0 }
  0x74   :  { %540 = vmatpush3.bf16.msra.mxu0 %v576_v37 }
 0x12a   :  { %v181_v24 = vpop.f32.mrb[0].mxu0 }
 0x12b   :  { %v182_v25 = vadd.f32 %v430_v23, %v181_v24  ;;  %v503_v26 = vpop.f32.mrb[1].mxu0 }
 0x12c   :  { %v184_v27 = vpop.f32.mrb[2].mxu0 }
 0x12d   :  { %v188_v28 = vmul.f32 0.01, %v182_v25  ;;  %v185_v29 = vadd.f32 %v430_v23, %v184_v27  ;;  %v504_v30 = vpop.f32.mrb[3].mxu0 }
 0x12f   :  { %v189_v31 = vmul.f32 0.01, %v185_v29  ;;  %v190_v32 = vmax.f32 %v182_v25, %v188_v28 }
 0x131   :  { %v191_v33 = vmax.f32 %v185_v29, %v189_v31 }
 0x133   :  { %v192_v34 = vpack.c.bf16 %v191_v33, %v190_v32 }
 0x135   :  { %522 = vmatmul.mubr.bf16.vlgmr.msra.gmra.mrb[0].mxu1 %v192_v34 }
 0x208   :  { %v298_v39 = vpop.f32.mrb[0].mxu1 }
 0x209   :  { %v299_v40 = vadd.f32 %v440_v38, %v298_v39  ;;  %v523_v41 = vpop.f32.mrb[1].mxu1 }
 0x20a   :  { %v301_v42 = vpop.f32.mrb[2].mxu1 }
 0x20b   :  { %v305_v43 = vmul.f32 0.01, %v299_v40  ;;  %v302_v44 = vadd.f32 %v440_v38, %v301_v42  ;;  %v524_v45 = vpop.f32.mrb[3].mxu1 }
 0x20d   :  { %v306_v46 = vmul.f32 0.01, %v302_v44  ;;  %v307_v47 = vmax.f32 %v299_v40, %v305_v43 }
 0x20f   :  { %v308_v48 = vmax.f32 %v302_v44, %v306_v46 }
 0x211   :  { %v309_v49 = vpack.c.bf16 %v308_v48, %v307_v47 }
 0x213   :  { %542 = vmatmul.mubr.bf16.vlgmr.msra.gmra.mrb[4].mxu0 %v309_v49 }
 0x2e6   :  { %v415_v51 = vpop.f32.mrb[4].mxu0 }
 0x2e7   :  { %v416_v52 = vadd.f32 %v449_v50, %v415_v51  ;;  %v543_v53 = vpop.f32.mrb[5].mxu0 }
 0x2e8   :  { %v418_v54 = vpop.f32.mrb[6].mxu0 }
 0x2e9   :  { %422 = vst [vmem:[%s801_s7] sm:$0xff] %v416_v52  ;;  %v419_v55 = vadd.f32 %v449_v50, %v418_v54  ;;  %v544_v56 = vpop.f32.mrb[7].mxu0 }
 0x2eb   :  { %423 = vst [vmem:[%s801_s7 + $0x8] sm:$0xff] %v419_v55 }
 0x2ec   :  { %428 = vsyncpa [#allocation3], 1 }
 0x2ed   :  { %429 = vsyncpa [#allocation5], 1 }

</bundles_post_ra>
